<compile_context>
chip_gen: v7x
topology: tpu7x:2x2x1
jax: 0.10.0
libtpu: 0.0.40
codegen_flags: <defaults>
</compile_context>

<pallas_src>
import functools

import jax
import jax.numpy as jnp
from jax.experimental import pallas as pl
from jax.experimental.pallas import tpu as pltpu


def _round_up(x, m):
    return ((x + m - 1) // m) * m


def _focal_loss_kernel(logits_ref, targets_ref, out_ref, *, alpha, gamma,
                       n_valid, tile_rows, c_valid, c_chunk, per_row):
    """One row-tile of focal loss.

    Emits either a per-tile partial sum (lane-dense (1,8,128) block) or the
    per-row losses ((tile,1) block) depending on `per_row`.
    """
    tile = logits_ref.shape[0]
    t = targets_ref[...]                                       # (T, 1) int32

    # Online logsumexp + target-logit gather over lane-aligned class chunks.
    # Keeps (tile, C)-sized f32 temporaries bounded by (tile, c_chunk).
    m = jnp.full((tile, 1), -jnp.inf, dtype=jnp.float32)       # running max
    s = jnp.zeros((tile, 1), dtype=jnp.float32)                # running sum exp
    x_t = jnp.zeros((tile, 1), dtype=jnp.float32)              # gathered x[target]

    for start in range(0, c_valid, c_chunk):                   # static unrolled
        width = min(c_chunk, c_valid - start)
        xb = logits_ref[:, start:start + width]                # (T, w) input dtype
        col = start + jax.lax.broadcasted_iota(jnp.int32, (tile, width), 1)
        # At most one match per row -> sum is exact even in bf16.
        x_t = x_t + jnp.sum(jnp.where(col == t, xb, jnp.zeros_like(xb)),
                            axis=-1, keepdims=True).astype(jnp.float32)
        # Max / select stay in the input dtype (bf16 VALU on v6e/v7x);
        # only the exp argument is upcast to f32.
        mb = jnp.max(xb, axis=-1, keepdims=True).astype(jnp.float32)
        m_new = jnp.maximum(m, mb)
        s = s * jnp.exp(m - m_new) + jnp.sum(
            jnp.exp(xb.astype(jnp.float32) - m_new), axis=-1, keepdims=True)
        m = m_new

    lse = m + jnp.log(s)                                       # (T, 1)
    ce = lse - x_t                                             # (T, 1), >= 0
    pt = jnp.exp(-ce)
    one_m_pt = 1.0 - pt

    # Integer gamma -> plain multiplies (avoids pow -> exp(gamma*log(.)) on EUP).
    if float(gamma).is_integer() and 0 <= int(gamma) <= 8:
        w = jnp.ones_like(one_m_pt)
        for _ in range(int(gamma)):
            w = w * one_m_pt
    else:
        w = one_m_pt ** jnp.float32(gamma)

    focal = jnp.float32(alpha) * w * ce                        # (T, 1)

    # Mask padding rows of the ragged trailing block (select -> NaN-safe).
    row = pl.program_id(0) * tile_rows + jax.lax.broadcasted_iota(
        jnp.int32, (tile, 1), 0)
    focal = jnp.where(row < n_valid, focal, 0.0)

    if per_row:
        out_ref[...] = focal
    else:
        # Lane-dense per-tile partial sum; no cross-step dependency so the grid
        # axis runs "parallel" on both TensorCores (v7x).
        out_ref[...] = jnp.full(out_ref.shape, jnp.sum(focal), dtype=jnp.float32)


def focal_loss(inputs, targets, *, alpha=1.0, gamma=2.0, reduction="mean",
               tile_rows=None, c_chunk=512):
    """inputs: [N, C] float logits (f32 or bf16); targets: [N] int class indices."""
    n, c = inputs.shape
    itemsize = jnp.dtype(inputs.dtype).itemsize

    # --- class-chunk size: lane-aligned so every chunk start is a multiple of 128
    if c <= int(c_chunk):
        kc = c
    else:
        kc = max(128, (int(c_chunk) // 128) * 128)

    # --- per-generation VMEM budget -----------------------------------------
    DEFAULT_PHYS_VMEM = 64 * 1024 * 1024          # v7x physical; safe lower bound
    try:
        info = pltpu.get_tpu_info()
        phys_vmem = int(getattr(info, "vmem_capacity_bytes", DEFAULT_PHYS_VMEM))
    except Exception:
        phys_vmem = DEFAULT_PHYS_VMEM
    # Ask Mosaic for 3/4 of physical VMEM (v5e/v6e: ~96 MiB, v7x: ~48 MiB).
    vmem_limit = max(32 * 1024 * 1024, int(phys_vmem) * 3 // 4)
    vmem_limit = min(vmem_limit, int(phys_vmem))
    # Budget used for row-tile sizing; leave slack for Mosaic-internal scratch.
    tile_budget = max(4 * 1024 * 1024, vmem_limit - 8 * 1024 * 1024)

    # Per-row VMEM footprint estimate:
    c_lanes = _round_up(c, 128)
    chunk_lanes = _round_up(kc, 128)
    bytes_per_row = (
        2 * itemsize * c_lanes        # double-buffered logits block
        + 6 * 4 * chunk_lanes         # in-kernel (tile, chunk) f32 temporaries
        + 2 * 4 * 128                 # double-buffered (tile,1) int32 targets (lane padded)
        + 10 * 4 * 128                # (tile,1) f32 carries / per-row output (lane padded)
    )

    # Sublane multiple: 8 for f32, 16 for bf16 (packed sublanes).
    sub = max(8, 32 // max(1, itemsize))
    cap = max(sub, (tile_budget // bytes_per_row) // sub * sub)

    if tile_rows is None:
        tile = min(cap, _round_up(n, sub))
        # Keep >=2 grid steps when possible so megacore chips use both TCs.
        if tile >= n and n > sub:
            tile = _round_up(pl.cdiv(n, 2), sub)
    else:
        tile = max(sub, min(_round_up(int(tile_rows), sub), cap))
    tile = max(sub, min(tile, cap))

    num_tiles = pl.cdiv(n, tile)
    n_pad = num_tiles * tile

    # No wrapper-side padding: Pallas handles the ragged trailing row block and
    # the kernel masks rows >= n before reducing.
    targets_2d = targets.astype(jnp.int32).reshape(n, 1)

    per_row = (reduction == "none")
    kernel = functools.partial(
        _focal_loss_kernel,
        alpha=float(alpha), gamma=float(gamma), n_valid=n, tile_rows=tile,
        c_valid=c, c_chunk=kc, per_row=per_row,
    )

    if per_row:
        out_shape = jax.ShapeDtypeStruct((n_pad, 1), jnp.float32)
        out_spec = pl.BlockSpec((tile, 1), lambda i: (i, 0))
    else:
        out_shape = jax.ShapeDtypeStruct((num_tiles, 8, 128), jnp.float32)
        out_spec = pl.BlockSpec((1, 8, 128), lambda i: (i, 0, 0))

    cost = pl.CostEstimate(
        flops=int(6 * n * c + 12 * n),
        transcendentals=int(n * c + 3 * n),
        bytes_accessed=int(n * c * itemsize + n * 4
                           + (n_pad * 4 if per_row else num_tiles * 8 * 128 * 4)),
    )

    result = pl.pallas_call(
        kernel,
        out_shape=out_shape,
        grid_spec=pltpu.PrefetchScalarGridSpec(
            num_scalar_prefetch=0,
            grid=(num_tiles,),
            in_specs=[
                pl.BlockSpec((tile, c), lambda i: (i, 0)),
                pl.BlockSpec((tile, 1), lambda i: (i, 0)),
            ],
            out_specs=out_spec,
        ),
        compiler_params=pltpu.CompilerParams(
            dimension_semantics=("parallel",),
            vmem_limit_bytes=int(vmem_limit),
        ),
        cost_estimate=cost,
    )(inputs, targets_2d)

    if per_row:
        return result[:n, 0]
    total = jnp.sum(result[:, 0, 0])
    if reduction == "mean":
        return total / jnp.float32(n)
    if reduction == "sum":
        return total
    raise ValueError(f"unknown reduction: {reduction!r}")


def _focal_loss_ref(inputs, targets, alpha=1.0, gamma=2.0, reduction="mean"):
    x = inputs.astype(jnp.float32)
    lse = jax.nn.logsumexp(x, axis=-1)
    x_t = jnp.take_along_axis(x, targets[:, None].astype(jnp.int32), axis=-1)[:, 0]
    ce = lse - x_t
    pt = jnp.exp(-ce)
    focal = alpha * (1.0 - pt) ** gamma * ce
    if reduction == "mean":
        return jnp.mean(focal)
    if reduction == "sum":
        return jnp.sum(focal)
    return focal


if __name__ == "__main__":
    key = jax.random.PRNGKey(0)
    k1, k2, k3, k4 = jax.random.split(key, 4)

    # --- Test 1: f32, mean, auto tile (>=2 tiles exercises the parallel grid)
    N, C = 64, 32
    logits = jax.random.normal(k1, (N, C), dtype=jnp.float32) * 2.0
    targets = jax.random.randint(k2, (N,), 0, C, dtype=jnp.int32)
    out = jax.block_until_ready(focal_loss(logits, targets, alpha=1.0, gamma=2.0))
    ref = _focal_loss_ref(logits, targets, alpha=1.0, gamma=2.0)
    assert jnp.allclose(out, ref, rtol=1e-5, atol=1e-5), (out, ref)

    # --- Test 2: f32, sum, small explicit tile (ragged last block, row mask)
    #     and C > c_chunk so the online-logsumexp class chunking is exercised.
    N2, C2 = 56, 256
    logits2 = jax.random.normal(k3, (N2, C2), dtype=jnp.float32) * 3.0
    targets2 = jax.random.randint(k4, (N2,), 0, C2, dtype=jnp.int32)
    out2 = jax.block_until_ready(
        focal_loss(logits2, targets2, alpha=0.25, gamma=2.0, reduction="sum",
                   tile_rows=16, c_chunk=128))
    ref2 = _focal_loss_ref(logits2, targets2, alpha=0.25, gamma=2.0,
                           reduction="sum")
    assert jnp.allclose(out2, ref2, rtol=1e-5, atol=1e-5), (out2, ref2)

    # --- Test 3: bf16 logits, reduction='none' (per-row path, lane-masked C)
    N3, C3 = 40, 20
    logits3 = (jax.random.normal(k1, (N3, C3), dtype=jnp.float32) * 2.0
               ).astype(jnp.bfloat16)
    targets3 = jax.random.randint(k2, (N3,), 0, C3, dtype=jnp.int32)
    out3 = jax.block_until_ready(
        focal_loss(logits3, targets3, alpha=1.0, gamma=2.0, reduction="none"))
    ref3 = _focal_loss_ref(logits3, targets3, alpha=1.0, gamma=2.0,
                           reduction="none")
    assert out3.shape == (N3,)
    assert jnp.allclose(out3, ref3, rtol=1e-4, atol=1e-5), (out3, ref3)

    print("KERNEL_OK")
</pallas_src>

<mosaic_0001>
module attributes {stable_mosaic.version = 11 : i64} {
  func.func @_focal_loss_kernel(%arg0: i32, %arg1: memref<32x32xf32, #tpu.memory_space<vmem>>, %arg2: memref<32x1xi32, #tpu.memory_space<vmem>>, %arg3: memref<1x8x128xf32, #tpu.memory_space<vmem>>) attributes {dimension_semantics = [#tpu.dimension_semantics<parallel>], iteration_bounds = array<i64: 2>, scalar_prefetch = 0 : i64, scratch_operands = 0 : i64, tpu.core_type = #tpu.core_type<tc>, window_params = [{transform_indices = @transform_0, window_bounds = array<i64: 32, 32>}, {transform_indices = @transform_1, window_bounds = array<i64: 32, 1>}, {transform_indices = @transform_2, window_bounds = array<i64: 1, 8, 128>}]} {
    %c0 = arith.constant 0 : index
    %c0_0 = arith.constant 0 : index
    %0 = vector.load %arg2[%c0, %c0_0] : memref<32x1xi32, #tpu.memory_space<vmem>>, vector<32x1xi32>
    %cst = arith.constant 0xFF800000 : f32
    %1 = vector.broadcast %cst : f32 to vector<32x1xf32>
    %cst_1 = arith.constant 0.000000e+00 : f32
    %2 = vector.broadcast %cst_1 : f32 to vector<32x1xf32>
    %cst_2 = arith.constant 0.000000e+00 : f32
    %3 = vector.broadcast %cst_2 : f32 to vector<32x1xf32>
    %c0_3 = arith.constant 0 : index
    %c0_4 = arith.constant 0 : index
    %4 = vector.load %arg1[%c0_3, %c0_4] : memref<32x32xf32, #tpu.memory_space<vmem>>, vector<32x32xf32>
    %5 = tpu.iota {dimensions = array<i32: 1>} : vector<32x32xi32>
    %c0_i32 = arith.constant 0 : i32
    %6 = vector.broadcast %c0_i32 : i32 to vector<32x32xi32>
    %7 = arith.addi %6, %5 : vector<32x32xi32>
    %8 = vector.broadcast %0 : vector<32x1xi32> to vector<32x32xi32>
    %9 = arith.cmpi eq, %7, %8 : vector<32x32xi32>
    %cst_5 = arith.constant 0.000000e+00 : f32
    %10 = vector.broadcast %cst_5 : f32 to vector<32x32xf32>
    %11 = arith.select %9, %4, %10 : vector<32x32xi1>, vector<32x32xf32>
    %cst_6 = arith.constant dense<0.000000e+00> : vector<32xf32>
    %12 = vector.multi_reduction <add>, %11, %cst_6 [1] : vector<32x32xf32> to vector<32xf32>
    %13 = vector.shape_cast %12 : vector<32xf32> to vector<32x1xf32>
    %14 = arith.addf %3, %13 : vector<32x1xf32>
    %cst_7 = arith.constant dense<0xFF800000> : vector<32xf32>
    %15 = vector.multi_reduction <maximumf>, %4, %cst_7 [1] : vector<32x32xf32> to vector<32xf32>
    %16 = vector.shape_cast %15 : vector<32xf32> to vector<32x1xf32>
    %17 = arith.maximumf %1, %16 : vector<32x1xf32>
    %18 = arith.subf %1, %17 : vector<32x1xf32>
    %19 = math.exp %18 : vector<32x1xf32>
    %20 = arith.mulf %2, %19 : vector<32x1xf32>
    %21 = vector.broadcast %17 : vector<32x1xf32> to vector<32x32xf32>
    %22 = arith.subf %4, %21 : vector<32x32xf32>
    %23 = math.exp %22 : vector<32x32xf32>
    %cst_8 = arith.constant dense<0.000000e+00> : vector<32xf32>
    %24 = vector.multi_reduction <add>, %23, %cst_8 [1] : vector<32x32xf32> to vector<32xf32>
    %25 = vector.shape_cast %24 : vector<32xf32> to vector<32x1xf32>
    %26 = arith.addf %20, %25 : vector<32x1xf32>
    %27 = math.log %26 : vector<32x1xf32>
    %28 = arith.addf %17, %27 : vector<32x1xf32>
    %29 = arith.subf %28, %14 : vector<32x1xf32>
    %cst_9 = arith.constant 0.000000e+00 : f32
    %30 = vector.broadcast %cst_9 : f32 to vector<32x1xf32>
    %31 = arith.subf %30, %29 : vector<32x1xf32>
    %32 = math.exp %31 : vector<32x1xf32>
    %cst_10 = arith.constant 1.000000e+00 : f32
    %33 = vector.broadcast %cst_10 : f32 to vector<32x1xf32>
    %34 = arith.subf %33, %32 : vector<32x1xf32>
    %cst_11 = arith.constant 1.000000e+00 : f32
    %35 = vector.broadcast %cst_11 : f32 to vector<32x1xf32>
    %36 = arith.mulf %35, %34 : vector<32x1xf32>
    %37 = arith.mulf %36, %34 : vector<32x1xf32>
    %cst_12 = arith.constant 1.000000e+00 : f32
    %38 = vector.broadcast %cst_12 : f32 to vector<32x1xf32>
    %39 = arith.mulf %38, %37 : vector<32x1xf32>
    %40 = arith.mulf %39, %29 : vector<32x1xf32>
    %c32_i32 = arith.constant 32 : i32
    %41 = arith.muli %arg0, %c32_i32 : i32
    %42 = tpu.iota {dimensions = array<i32: 0>} : vector<32x1xi32>
    %43 = vector.broadcast %41 : i32 to vector<32x1xi32>
    %44 = arith.addi %43, %42 : vector<32x1xi32>
    %c64_i32 = arith.constant 64 : i32
    %45 = vector.broadcast %c64_i32 : i32 to vector<32x1xi32>
    %46 = arith.cmpi slt, %44, %45 : vector<32x1xi32>
    %cst_13 = arith.constant 0.000000e+00 : f32
    %47 = vector.broadcast %cst_13 : f32 to vector<32x1xf32>
    %48 = arith.select %46, %40, %47 : vector<32x1xi1>, vector<32x1xf32>
    %49 = vector.shape_cast %48 : vector<32x1xf32> to vector<1x32x1xf32>
    %cst_14 = arith.constant dense<0.000000e+00> : vector<1xf32>
    %50 = vector.multi_reduction <add>, %49, %cst_14 [1, 2] : vector<1x32x1xf32> to vector<1xf32>
    %51 = vector.shape_cast %50 : vector<1xf32> to vector<1x1x1xf32>
    %52 = vector.extract %51[0, 0, 0] : f32 from vector<1x1x1xf32>
    %53 = vector.broadcast %52 : f32 to vector<1x8x128xf32>
    %c0_15 = arith.constant 0 : index
    %c0_16 = arith.constant 0 : index
    %c0_17 = arith.constant 0 : index
    %54 = vector.load %arg3[%c0_15, %c0_16, %c0_17] : memref<1x8x128xf32, #tpu.memory_space<vmem>>, vector<1x8x128xf32>
    tpu.vector_store %arg3[%c0_15, %c0_16, %c0_17], %53 {strides = array<i32>} : memref<1x8x128xf32, #tpu.memory_space<vmem>>, vector<1x8x128xf32>,
    return
  }
  func.func @transform_0(%arg0: i32) -> (i32, i32) {
    %c0_i32 = arith.constant 0 : i32
    %c0_i32_0 = arith.constant 0 : i32
    return %arg0, %c0_i32 : i32, i32
  }
  func.func @transform_1(%arg0: i32) -> (i32, i32) {
    %c0_i32 = arith.constant 0 : i32
    %c0_i32_0 = arith.constant 0 : i32
    return %arg0, %c0_i32 : i32, i32
  }
  func.func @transform_2(%arg0: i32) -> (i32, i32, i32) {
    %c0_i32 = arith.constant 0 : i32
    %c0_i32_0 = arith.constant 0 : i32
    %c0_i32_1 = arith.constant 0 : i32
    return %arg0, %c0_i32, %c0_i32_0 : i32, i32, i32
  }
}

</mosaic_0001>

<bundles_post_ra>
// kernel: tpu_custom_call.1
= control target key start
LH: loop header
LB: loop body
LE: loop exit
PB: predicated region body
PF: predicated region fallthrough
CT: control target
= control target key end

     0   :  { %7 = vsyncpa [#allocation3], 0  ;;  %s745_s0 = inlined_call_operand.vmem [shape: f32[64,32], index: 0, kind: input, shape index: {}]   ;;  %s746_s1 = inlined_call_operand.vmem [shape: s32[64,1], index: 1, kind: input, shape index: {}]   ;;  %s747_s2 = inlined_call_operand.hbm [shape: f32[2,8,128], index: 2, kind: output, shape index: {}]  }
   0x1   :  { %9 = vsyncpa [#allocation3 + $0x1], 0  ;;  %s603_s9 = smov 0   ;;  %s605_s10 = smov 0  }
   0x2   :  { %s607_s11 = smov 0   ;;  %s609_s12 = smov 0  }
   0x3 LB: > { %s624_s13 = sadd.s32 4294967295, %s584_s12   ;;  %s432_s14 = sadd.s32 4294967294, %s584_s12   ;;  %s584_s12 = sphi %s609_s12, %s753_s12   ;;  %s580_s11 = sphi %s607_s11, %s752_s11   ;;  %s576_s10 = sphi %s605_s10, %s751_s10   ;;  %s572_s9 = sphi %s603_s9, %s750_s9  }
   0x4   : > { %s628_s15 = sadd.s32 1, %s584_s12   ;;  %s74_s16 = sadd.s32 1, %s580_s11 }
   0x5   : > { %s71_s17 = ssub.s32 %s584_s12, %s628_s15  ;;  %p84_p0 = scmp.ne.s32.totalorder %s580_s11, %s576_s10 }
   0x6   : > { %p72_p1 = scmp.eq.s32.totalorder %s71_s17, 0  ;;  %p85_p2 = scmp.eq.s32.totalorder %s624_s13, 1 }
   0x7   : > { %p90_p3 = scmp.ne.s32.totalorder %s576_s10, %s572_s9  ;;  %p91_p4 = scmp.eq.s32.totalorder %s432_s14, 1 }
   0x8   : > { %s639_s18 = scalar_select %p72_p1, %s580_s11, %s74_s16  }
   0x9   : > { %p641_p5 = por %p85_p2, %p84_p0  ;;  %p645_p6 = por %p91_p4, %p90_p3 }
   0xa   : > { %p435_p7 = scmp.ge.s32.totalorder %s584_s12, 1  ;;  %p127_p8 = scmp.lt.s32.totalorder %s584_s12, 3 }
   0xc   : > { %p128_p9 = pnand %p435_p7, %p127_p8 }
   0xd   : > { %s437_s21 = sshll.u32 (!%p128_p9), %s624_s13, 2  ;;  %v586_v0 = vmov (!%p128_p9), 0   ;;  %vm196_vm0 = vcmask (!%p128_p9), 261120   ;;  %v174_v26 = vlaneseq (!%p128_p9)  ;;  %s441_s29 = sshll.u32 (!%p128_p9), %s624_s13, 5  ;;  %vm328_vm8 = vcmask (!%p128_p9), 7168  }
   0xe   : > { %131 = sbr.rel (%p128_p9) target bundleno = 598 (0x256), region = 28  ;;  %p155_p10 = scmp.lt.s32.totalorder (!%p128_p9), %s437_s21, 7  ;;  %489 = vset.pattern.permute.xlu1 (!%p128_p9), %v586_v0  ;;  %488 = vset.pattern.permute.xlu0 (!%p128_p9), %v586_v0 }
   0xf   : > { %v175_v27 = vand.u32 (!%p128_p9), 127, %v174_v26  ;;  %s151_s30 = sand.u32 (!%p128_p9), 1, %s576_s10   ;;  %s443_s6 = sshll.u32 (!%p128_p9), %s624_s13, 7 }
  0x10   : > { %s436_s3 = sshll.u32 (!%p128_p9), %s151_s30, 3  ;;  %s705_s16 = scalar_lea.hbm (!%p128_p9), %s747_s2, %s443_s6 }
  0x11   : > { %s153_s4 = scalar_lea.vmem (!%p128_p9), [#allocation2], %s436_s3  ;;  %s348_s17 = scalar_lea.sflag (!%p128_p9), [#allocation3], %s151_s30 }
  0x12   : > { %s361_s5 = sshll.u32 (!%p128_p9), %s153_s4, 4  ;;  %s587_s13 = smov (!%p128_p9), [#allocation2]   ;;  %s700_s5 = int_to_ptr.vmem [resolvable:$true] %s361_s5 }
  0x15   : > { %s755_s21 = smov (!%p155_p10, %s437_s21), 7 }
  0x16   : > { %s438_s22 = sshll.u32 %s755_s21, 3  ;;  %s522_s21 = scalar_lea.vmem %s700_s5, 128 }
  0x17   : > { %s158_s25 = scalar_lea.vmem %s745_s0, %s438_s22  ;;  %s164_s28 = scalar_lea.vmem %s746_s1, %s438_s22 }
  0x18   : > { %v170_v1 = vld [vmem:[%s158_s25] sm:$0xff]  ;;  %v172_v2 = vld [vmem:[%s158_s25 + $0x10] sm:$0xff]  ;;  %v171_v3 = vld [vmem:[%s158_s25 + $0x8] sm:$0xff]  ;;  %p523_p11 = scmp.ne.s32.totalorder %s700_s5, %s522_s21  ;;  %s526_s22 = sshll.u32 %s587_s13, 4  ;;  %s527_s22 = int_to_ptr.vmem [resolvable:$false] %s526_s22 }
  0x19   : > { %v213_v4 = vsel %vm196_vm0, %v170_v1, -inf  ;;  %v219_v5 = vsel %vm196_vm0, %v172_v2, -inf  ;;  %v657_v6 = vld [vmem:[%s158_s25 + $0x18] sm:$0xff]  ;;  %v216_v7 = vsel %vm196_vm0, %v171_v3, -inf  ;;  %v167_v9 = vld [vmem:[%s164_s28 + $0x8] sm:$0xff]  ;;  %v168_v10 = vld [vmem:[%s164_s28 + $0x10] sm:$0xff]  ;;  %p529_p0 = scmp.lt.s32.totalorder %s700_s5, %s527_s22 }
  0x1a   : > { %214 = vmax.xlane.f32.xlu0 %v213_v4  ;;  %220 = vmax.xlane.f32.xlu1 %v219_v5  ;;  %v222_v8 = vsel %vm196_vm0, %v657_v6, -inf  ;;  %v166_v11 = vld [vmem:[%s164_s28] sm:$0xff]  ;;  %v169_v12 = vld [vmem:[%s164_s28 + $0x18] sm:$0xff]  ;;  %p524_p12 = pnand %p523_p11, %p641_p5  ;;  %s528_s23 = scalar_lea.vmem %s527_s22, 256 }
  0x1b   : > { %p530_p1 = scmp.lt.s32.totalorder %s528_s23, %s522_s21 }
  0x1c   : > { %p525_p13 = pneg %p524_p12 }
  0x1d   : > { %p531_p2 = por %p530_p1, %p529_p0 }
  0x1e   : > { %217 = vmax.xlane.f32.xlu0 %v216_v7  ;;  %223 = vmax.xlane.f32.xlu1 %v222_v8 }
  0x1f   : > { %p532_p3 = pnand %p531_p2, %p525_p13 }
  0x2f   : > { %180 = vperm.xlu1 %489, %v167_v9  }
  0x33   : > { %183 = vperm.xlu1 %489, %v168_v10  }
  0x34   : > { %177 = vperm.xlu0 %488, %v166_v11  }
  0x37   : > { %186 = vperm.xlu1 %489, %v169_v12  }
  0xa7   : > { %v665_v13 = vpop.xlane.xlu0 %214  ;;  %v667_v14 = vpop.xlane.xlu1 %220 }
  0xa8   : > { %v241_v15 = vsub.f32 %v170_v1, %v665_v13  ;;  %v243_v16 = vsub.f32 %v172_v2, %v667_v14  ;;  %v225_v47 = vsub.f32 -inf, %v665_v13  ;;  %v227_v48 = vsub.f32 -inf, %v667_v14 }
  0xaa   : > { %v245_v17 = vmul.f32 1.442695, %v241_v15  ;;  %v249_v18 = vmul.f32 1.442695, %v243_v16  ;;  %v229_v49 = vmul.f32 1.442695, %v225_v47 }
  0xab   : > { %v671_v19 = vpop.xlane.xlu0 %217  ;;  %v673_v20 = vpop.xlane.xlu1 %223  ;;  %v233_v51 = vmul.f32 1.442695, %v227_v48 }
  0xac   : > { %v242_v21 = vsub.f32 %v171_v3, %v671_v19  ;;  %490 = vpow2.f32 %v245_v17  ;;  %v244_v22 = vsub.f32 %v657_v6, %v673_v20  ;;  %v226_v50 = vsub.f32 -inf, %v671_v19 }
  0xad   : > { %492 = vpow2.f32 %v249_v18  ;;  %v228_v53 = vsub.f32 -inf, %v673_v20 }
  0xae   : > { %v247_v23 = vmul.f32 1.442695, %v242_v21  ;;  %v251_v24 = vmul.f32 1.442695, %v244_v22  ;;  %v231_v52 = vmul.f32 1.442695, %v226_v50 }
  0xaf   : > { %v181_v25 = vpop.permute.xlu1 %180  ;;  %v235_v54 = vmul.f32 1.442695, %v228_v53 }
  0xb0   : > { %494 = vpow2.f32 %v247_v23  ;;  %vm189_vm3 = vcmp.eq.s32.totalorder %v175_v27, %v181_v25 }
  0xb1   : > { %496 = vpow2.f32 %v251_v24  ;;  %v193_v43 = vsel %vm189_vm3, %v171_v3, 0.0 }
  0xb2   : > { %v200_v44 = vsel %vm196_vm0, %v193_v43, 0.0  ;;  %498 = vpow2.f32 %v229_v49 }
  0xb3   : > { %v184_v29 = vpop.permute.xlu1 %183  ;;  %v178_v32 = vpop.permute.xlu0 %177  ;;  %500 = vpow2.f32 %v233_v51 }
  0xb4   : > { %vm190_vm1 = vcmp.eq.s32.totalorder %v175_v27, %v184_v29  ;;  %vm188_vm2 = vcmp.eq.s32.totalorder %v175_v27, %v178_v32  ;;  %502 = vpow2.f32 %v231_v52 }
  0xb5   : > { %v194_v35 = vsel %vm190_vm1, %v172_v2, 0.0  ;;  %v192_v40 = vsel %vm188_vm2, %v170_v1, 0.0  ;;  %504 = vpow2.f32 %v235_v54 }
  0xb6   : > { %v491_v28 = vpop.eup %490  ;;  %v203_v39 = vsel %vm196_vm0, %v194_v35, 0.0  ;;  %v197_v41 = vsel %vm196_vm0, %v192_v40, 0.0 }
  0xb7   : > { %v253_v30 = vsel %vm196_vm0, %v491_v28, 0.0  ;;  %v493_v31 = vpop.eup %492  ;;  %v187_v42 = vpop.permute.xlu1 %186 }
  0xb8   : > { %254 = vadd.xlane.f32.xlu1 %v253_v30  ;;  %v259_v33 = vsel %vm196_vm0, %v493_v31, 0.0  ;;  %vm191_vm4 = vcmp.eq.s32.totalorder %v175_v27, %v187_v42 }
  0xb9   : > { %v195_v45 = vsel %vm191_vm4, %v657_v6, 0.0 }
  0xba   : > { %v495_v34 = vpop.eup %494  ;;  %v206_v46 = vsel %vm196_vm0, %v195_v45, 0.0 }
  0xbb   : > { %v256_v36 = vsel %vm196_vm0, %v495_v34, 0.0  ;;  %v497_v37 = vpop.eup %496 }
  0xbc   : > { %260 = vadd.xlane.f32.xlu1 %v259_v33  ;;  %257 = vadd.xlane.f32.xlu0 %v256_v36  ;;  %v262_v38 = vsel %vm196_vm0, %v497_v37, 0.0  ;;  %v499_v55 = vpop.eup %498 }
  0xbd   : > { %v501_v56 = vpop.eup %500  ;;  %v237_v57 = vmul.f32 0.0, %v499_v55 }
  0xbe   : > { %v503_v58 = vpop.eup %502  ;;  %v239_v61 = vmul.f32 0.0, %v501_v56 }
  0xbf   : > { %v238_v62 = vmul.f32 0.0, %v503_v58  ;;  %v505_v63 = vpop.eup %504 }
  0xc0   : > { %263 = vadd.xlane.f32.xlu1 %v262_v38  ;;  %204 = vadd.xlane.f32.xlu0 %v203_v39  ;;  %v240_v4 = vmul.f32 0.0, %v505_v63  ;;  %v315_v39 = vstv %s441_s29 }
  0xc4   : > { %198 = vadd.xlane.f32.xlu1 %v197_v41 }
  0xc8   : > { %201 = vadd.xlane.f32.xlu1 %v200_v44 }
  0xcc   : > { %207 = vadd.xlane.f32.xlu1 %v206_v46 }
 0x145   : > { %v255_v59 = vpop.xlane.xlu1 %254 }
 0x146   : > { %v265_v60 = vadd.f32 %v255_v59, %v237_v57 }
 0x148   : > { %506 = vlog2.f32 %v265_v60 }
 0x149   : > { %v261_v0 = vpop.xlane.xlu1 %260  ;;  %v258_v1 = vpop.xlane.xlu0 %257 }
 0x14a   : > { %v267_v2 = vadd.f32 %v261_v0, %v239_v61  ;;  %v266_v3 = vadd.f32 %v258_v1, %v238_v62 }
 0x14c   : > { %508 = vlog2.f32 %v267_v2 }
 0x14d   : > { %510 = vlog2.f32 %v266_v3  ;;  %v264_v5 = vpop.xlane.xlu1 %263  ;;  %v205_v25 = vpop.xlane.xlu0 %204 }
 0x14e   : > { %v268_v6 = vadd.f32 %v264_v5, %v240_v4 }
 0x150   : > { %512 = vlog2.f32 %v268_v6 }
 0x151   : > { %v199_v8 = vpop.xlane.xlu1 %198 }
 0x152   : > { %v507_v7 = vpop.eup %506 }
 0x153   : > { %v270_v9 = vmul.f32 0.6931472, %v507_v7 }
 0x155   : > { %v277_v10 = vadd.f32 %v270_v9, %v665_v13  ;;  %v202_v18 = vpop.xlane.xlu1 %201 }
 0x156   : > { %v509_v11 = vpop.eup %508 }
 0x157   : > { %v511_v12 = vpop.eup %510  ;;  %v274_v15 = vmul.f32 0.6931472, %v509_v11  ;;  %v281_v16 = vsub.f32 %v277_v10, %v199_v8 }
 0x158   : > { %v272_v17 = vmul.f32 0.6931472, %v511_v12 }
 0x159   : > { %v285_v21 = vsub.f32 0.0, %v281_v16  ;;  %v279_v22 = vadd.f32 %v274_v15, %v667_v14  ;;  %v208_v33 = vpop.xlane.xlu1 %207 }
 0x15a   : > { %v513_v23 = vpop.eup %512  ;;  %v278_v24 = vadd.f32 %v272_v17, %v671_v19  ;;  %v311_v19 = vshrl.u32 %v174_v26, 7 }
 0x15b   : > { %v276_v27 = vmul.f32 0.6931472, %v513_v23  ;;  %v289_v28 = vmul.f32 1.442695, %v285_v21  ;;  %v283_v29 = vsub.f32 %v279_v22, %v205_v25 }
 0x15c   : > { %v282_v30 = vsub.f32 %v278_v24, %v202_v18  ;;  %v312_v41 = vadd.s32 8, %v311_v19  ;;  %v313_v42 = vadd.s32 16, %v311_v19  ;;  %v316_v43 = vadd.s32 %v315_v39, %v311_v19 }
 0x15d   : > { %514 = vpow2.f32 %v289_v28  ;;  %v287_v13 = vsub.f32 0.0, %v283_v29  ;;  %v280_v31 = vadd.f32 %v276_v27, %v673_v20  ;;  %v314_v45 = vadd.s32 24, %v311_v19 }
 0x15e   : > { %v286_v32 = vsub.f32 0.0, %v282_v30  ;;  %v317_v47 = vadd.s32 %v315_v39, %v312_v41  ;;  %v318_v48 = vadd.s32 %v315_v39, %v313_v42  ;;  %vm320_vm5 = vcmp.lt.s32.totalorder %v316_v43, 64 }
 0x15f   : > { %v293_v34 = vmul.f32 1.442695, %v287_v13  ;;  %v284_v35 = vsub.f32 %v280_v31, %v208_v33  ;;  %v319_v26 = vadd.s32 %v315_v39, %v314_v45 }
 0x160   : > { %v291_v36 = vmul.f32 1.442695, %v286_v32  ;;  %vm321_vm6 = vcmp.lt.s32.totalorder %v317_v47, 64  ;;  %vm322_vm7 = vcmp.lt.s32.totalorder %v318_v48, 64 }
 0x161   : > { %516 = vpow2.f32 %v293_v34  ;;  %v288_v14 = vsub.f32 0.0, %v284_v35  ;;  %vm323_vm9 = vcmp.lt.s32.totalorder %v319_v26, 64 }
 0x162   : > { %518 = vpow2.f32 %v291_v36 }
 0x163   : > { %v295_v37 = vmul.f32 1.442695, %v288_v14 }
 0x165   : > { %520 = vpow2.f32 %v295_v37 }
 0x167   : > { %v515_v38 = vpop.eup %514 }
 0x168   : > { %v297_v40 = vsub.f32 1.0, %v515_v38 }
 0x16a   : > { %v301_v20 = vmul.f32 %v297_v40, %v297_v40 }
 0x16b   : > { %v517_v44 = vpop.eup %516 }
 0x16c   : > { %v519_v46 = vpop.eup %518  ;;  %v299_v49 = vsub.f32 1.0, %v517_v44  ;;  %v305_v50 = vmul.f32 %v301_v20, %v281_v16 }
 0x16d   : > { %v298_v51 = vsub.f32 1.0, %v519_v46 }
 0x16e   : > { %v303_v52 = vmul.f32 %v299_v49, %v299_v49  ;;  %v324_v57 = vsel %vm320_vm5, %v305_v50, 0.0 }
 0x16f   : > { %v521_v53 = vpop.eup %520  ;;  %v302_v54 = vmul.f32 %v298_v51, %v298_v51  ;;  %v329_v62 = vsel %vm328_vm8, %v324_v57, 0.0 }
 0x170   : > { %v307_v55 = vmul.f32 %v303_v52, %v283_v29  ;;  %v300_v56 = vsub.f32 1.0, %v521_v53 }
 0x171   : > { %v306_v58 = vmul.f32 %v302_v54, %v282_v30 }
 0x172   : > { %v304_v59 = vmul.f32 %v300_v56, %v300_v56  ;;  %v326_v61 = vsel %vm322_vm7, %v307_v55, 0.0 }
 0x173   : > { %v325_v60 = vsel %vm321_vm6, %v306_v58, 0.0  ;;  %v332_v3 = vsel %vm328_vm8, %v326_v61, 0.0 }
 0x174   : > { %v330_v63 = vsel %vm328_vm8, %v325_v60, 0.0  ;;  %v308_v0 = vmul.f32 %v304_v59, %v284_v35 }
 0x175   : > { %v331_v1 = vadd.f32 %v330_v63, %v329_v62 }
 0x176   : > { %v327_v2 = vsel %vm323_vm9, %v308_v0, 0.0 }
 0x177   : > { %v333_v4 = vadd.f32 %v332_v3, %v331_v1  ;;  %v334_v5 = vsel %vm328_vm8, %v327_v2, 0.0 }
 0x179   : > { %v335_v6 = vadd.f32 %v334_v5, %v333_v4 }
 0x17b   : > { %336 = vadd.xlane.f32.xlu0 %v335_v6 }
 0x208   : > { %v337_v7 = vpop.xlane.xlu0 %336 }
 0x209   : > { %v338_v8 = vrot.slane %v337_v7, 4 }
 0x20b   : > { %v339_v9 = vadd.f32 %v338_v8, %v337_v7 }
 0x20d   : > { %v340_v10 = vrot.slane %v339_v9, 2 }
 0x20f   : > { %v341_v11 = vadd.f32 %v340_v10, %v339_v9 }
 0x211   : > { %v342_v12 = vrot.slane %v341_v11, 1 }
 0x213   : > { %v343_v15 = vadd.f32 %v342_v12, %v341_v11 }
 0x215   : > { %446 = vpush %v343_v15 }
 0x246   : > { %s447_s7 = spop %446 }
 0x247   : > { %v345_v16 = vstv %s447_s7 }
 0x248   : > { %346 = vst [vmem:[%s153_s4] sm:$0xff] %v345_v16 }
 0x249   : > { %535 = shalt.err (!%p532_p3)
}
 0x24a   : > { %s536_s24 = scalar_lea.hbm %s705_s16, 128  ;;  %s540_s27 = scalar_lea.hbm %s747_s2, 256 }
 0x24b   : > { %p537_p4 = scmp.ne.s32.totalorder %s705_s16, %s536_s24  ;;  %p541_p9 = scmp.lt.u32.totalorder %s705_s16, %s747_s2 }
 0x24c   : > { %p542_p10 = scmp.lt.u32.totalorder %s540_s27, %s536_s24  ;;  %p544_p12 = scmp.lt.u32.totalorder %s536_s24, %s705_s16 }
 0x24d   : > { %p538_p7 = pnand %p537_p4, %p641_p5 }
 0x24e   : > { %p543_p11 = por %p542_p10, %p541_p9 }
 0x24f   : > { %p539_p8 = pneg %p538_p7 }
 0x250   : > { %p545_p13 = por %p544_p12, %p543_p11 }
 0x252   : > { %p546_p0 = pnand %p545_p13, %p539_p8 }
 0x254   : > { %549 = shalt.err (!%p546_p0)
}
 0x255   : > { %448 = dma.vmem_to_hbm [thread:$0]  (%p641_p5), %s700_s5, 128, %s705_s16, %s348_s17  }
 0x256 PF: > { %p454_p1 = scmp.ge.s32.totalorder %s584_s12, 2  ;;  %s373_s30 = sand.u32 1, %s572_s9  }
 0x257   : > { %s374_s3 = scalar_lea.sflag [#allocation3], %s373_s30 }
 0x258   : > { %p451_p2 = pnand %p454_p1, %p645_p6 }
 0x25a   : > { %567 = dma.done.wait (!%p451_p2), %s374_s3, 128  }
 0x25b   : > { %569 = vsyncadd (!%p451_p2), %s374_s3, 4294967168  ;;  %p12_p3 = scmp.ge.s32.totalorder %s628_s15, 4   ;;  %s750_s9 = smov %s576_s10 }
 0x25c   : > { %s751_s10 = smov %s580_s11  ;;  %s752_s11 = smov %s639_s18 }
 0x25d   : > { %s753_s12 = smov %s628_s15  ;;  %14 = sbr.rel (!%p12_p3) target bundleno = 3 (0x3), region = 66 }
 0x264   :  { %379 = vsyncpa [#allocation3], 1 }
 0x265   :  { %381 = vsyncpa [#allocation3 + $0x1], 1 }

</bundles_post_ra>
